<compile_context>
chip_gen: v7x
topology: tpu7x:2x2x1
jax: 0.10.0
libtpu: 0.0.40
codegen_flags: <defaults>
</compile_context>

<pallas_src>
import functools
import math

import jax
import jax.numpy as jnp
from jax import lax
from jax.experimental import pallas as pl
from jax.experimental.pallas import tpu as pltpu

_MIB = 1024 * 1024


# ----------------------------------------------------------------------------
# Kernel 1: fused, lane-dense Q/K/V projection.
#   x (b, t, k) -> q/k/v (b, t, heads*k) in bf16 (f32 accumulation on the MXU).
# The query weights are already pre-scaled by 1/sqrt(k) in the wrapper.
# ----------------------------------------------------------------------------
def _qkv_proj_kernel(x_ref, wq_ref, wk_ref, wv_ref, q_ref, k_ref, v_ref, *,
                     mm_dtype):
    x = x_ref[0]                                                   # (tt, k)
    q_ref[0] = jnp.dot(x, wq_ref[...],
                       preferred_element_type=jnp.float32).astype(mm_dtype)
    k_ref[0] = jnp.dot(x, wk_ref[...],
                       preferred_element_type=jnp.float32).astype(mm_dtype)
    v_ref[0] = jnp.dot(x, wv_ref[...],
                       preferred_element_type=jnp.float32).astype(mm_dtype)


# ----------------------------------------------------------------------------
# Kernel 2: flash-style attention (online softmax over KV tiles) + unifyHeads.
#   grid = (batch, q_tiles, kv_tiles); kv is the last, "arbitrary" axis.
# ----------------------------------------------------------------------------
def _attention_kernel(q_ref, k_ref, v_ref, wu_ref, bu_ref, o_ref,
                      m_sc, l_sc, acc_sc, hout_sc, *, k, heads, mm_dtype):
    kv = pl.program_id(2)

    @pl.when(kv == 0)
    def _init():
        m_sc[...] = jnp.full_like(m_sc, -jnp.inf)
        l_sc[...] = jnp.zeros_like(l_sc)
        acc_sc[...] = jnp.zeros_like(acc_sc)

    q_all = q_ref[0]            # (tq,  heads*k) bf16, queries pre-scaled
    k_all = k_ref[0]            # (tkv, heads*k) bf16
    v_all = v_ref[0]            # (tkv, heads*k) bf16

    # Per-head online softmax. heads is small here, so a static unroll is fine.
    # TODO(synk): for heads >= 16 switch to lax.fori_loop with
    # pl.ds(pl.multiple_of(h * k, k), k) slices to bound vreg live ranges.
    for h in range(heads):
        lo = h * k
        qh = q_all[:, lo:lo + k]                                   # (tq,  k)
        kh = k_all[:, lo:lo + k]                                   # (tkv, k)
        vh = v_all[:, lo:lo + k]                                   # (tkv, k)

        # Scores: contract the feature axis directly (no explicit transpose).
        s = lax.dot_general(qh, kh, (((1,), (1,)), ((), ())),
                            preferred_element_type=jnp.float32)    # (tq, tkv)

        m_prev = m_sc[:, h:h + 1]                                  # (tq, 1)
        m_new = jnp.maximum(m_prev, jnp.max(s, axis=-1, keepdims=True))
        alpha = jnp.exp(m_prev - m_new)                            # f32
        p = jnp.exp(s - m_new)                                     # (tq, tkv)
        l_sc[:, h:h + 1] = alpha * l_sc[:, h:h + 1] + jnp.sum(
            p, axis=-1, keepdims=True)
        pv = jnp.dot(p.astype(mm_dtype), vh,
                     preferred_element_type=jnp.float32)           # (tq, k)
        acc_sc[:, lo:lo + k] = alpha * acc_sc[:, lo:lo + k] + pv
        m_sc[:, h:h + 1] = m_new

    @pl.when(kv == pl.num_programs(2) - 1)
    def _finalize():
        inv_l = pl.reciprocal(l_sc[...], approx=True)              # (tq, heads)
        for h in range(heads):
            lo = h * k
            hout_sc[:, lo:lo + k] = (acc_sc[:, lo:lo + k] *
                                     inv_l[:, h:h + 1]).astype(mm_dtype)
        # unifyHeads: single (tq, hk) @ (hk, k) matmul + bias.
        out = jnp.dot(hout_sc[...], wu_ref[...],
                      preferred_element_type=jnp.float32)          # (tq, k)
        o_ref[0] = (out + bu_ref[...]).astype(o_ref.dtype)


# ----------------------------------------------------------------------------
# Wrapper helpers.
# ----------------------------------------------------------------------------
def _physical_vmem_bytes():
    """Best-effort per-core VMEM capacity; conservative (v7x) fallback."""
    phys = 64 * _MIB
    try:
        info = pltpu.get_tpu_info()
        phys = int(getattr(info, "vmem_capacity_bytes", phys)) or phys
    except Exception:
        pass
    return phys


def _vmem_limit_bytes(footprint_bytes):
    """Scoped-VMEM limit sized from the real footprint (>= 32 MiB), clamped
    with headroom below physical VMEM (128 MiB v5e/v6e, 64 MiB v7x)."""
    want = max(32 * _MIB, int(footprint_bytes) * 2)
    return int(min(want, (_physical_vmem_bytes() * 3) // 4))


def _pick_seq_tile(t, per_row_bytes, budget_bytes,
                   prefer=(512, 256, 128, 64, 32, 16)):
    """Largest preferred tile that divides t and fits the per-axis VMEM budget.
    Preferred sizes are MXU-friendly (multiples of 256/128) and never below 16
    (bf16 sublane min-tile) unless the tile is the full sequence, which is
    always a legal block shape."""
    for cand in prefer:
        if t % cand == 0 and cand * per_row_bytes <= budget_bytes:
            return cand
    return t


def self_attention(x, wq_t, wk_t, wv_t, wu_t, bu, *, heads,
                   mm_dtype=jnp.bfloat16):
    """x: (b, t, k). wq_t/wk_t/wv_t: (k, heads*k). wu_t: (heads*k, k). bu: (k,)."""
    b, t, k = x.shape
    hk = heads * k
    out_dtype = x.dtype

    # MXU inputs in bf16 (f32 accumulation inside the kernels). The torch
    # k**-0.25 scaling of queries and keys is folded once into the query
    # projection weights here.
    x_mm = x.astype(mm_dtype)
    wq_mm = (wq_t * (1.0 / math.sqrt(float(k)))).astype(mm_dtype)
    wk_mm = wk_t.astype(mm_dtype)
    wv_mm = wv_t.astype(mm_dtype)
    wu_mm = wu_t.astype(mm_dtype)
    bu2 = bu.reshape(1, k).astype(jnp.float32)

    # VMEM-aware sequence tiling (per-axis budget keeps total well under the
    # v7x 64 MiB physical VMEM even with double-buffered blocks).
    budget = 12 * _MIB
    tt = _pick_seq_tile(t, 4 * k + 12 * hk, budget)              # projection
    tq = _pick_seq_tile(t, 10 * hk + 8 * k + 1024, budget)       # query rows
    tkv = _pick_seq_tile(t, 8 * hk, budget)                      # kv rows
    n_t, n_q, n_kv = t // tt, t // tq, t // tkv

    def run(single_buffer_consts):
        if single_buffer_consts:
            def const_spec(shape, index_map):
                # Grid-invariant operand: single-buffer to save VMEM (v7x).
                return pl.BlockSpec(shape, index_map,
                                    pipeline_mode=pl.Buffered(1))
        else:
            def const_spec(shape, index_map):
                return pl.BlockSpec(shape, index_map)

        # ---------------- Q/K/V projection ----------------
        proj_foot = tt * (4 * k + 12 * hk) + 3 * k * hk * 2
        q_all, k_all, v_all = pl.pallas_call(
            functools.partial(_qkv_proj_kernel, mm_dtype=mm_dtype),
            out_shape=(
                jax.ShapeDtypeStruct((b, t, hk), mm_dtype),
                jax.ShapeDtypeStruct((b, t, hk), mm_dtype),
                jax.ShapeDtypeStruct((b, t, hk), mm_dtype),
            ),
            grid_spec=pltpu.PrefetchScalarGridSpec(
                num_scalar_prefetch=0,
                grid=(b, n_t),
                in_specs=[
                    pl.BlockSpec((1, tt, k), lambda i, j: (i, j, 0)),
                    const_spec((k, hk), lambda i, j: (0, 0)),
                    const_spec((k, hk), lambda i, j: (0, 0)),
                    const_spec((k, hk), lambda i, j: (0, 0)),
                ],
                out_specs=[
                    pl.BlockSpec((1, tt, hk), lambda i, j: (i, j, 0)),
                    pl.BlockSpec((1, tt, hk), lambda i, j: (i, j, 0)),
                    pl.BlockSpec((1, tt, hk), lambda i, j: (i, j, 0)),
                ],
            ),
            compiler_params=pltpu.CompilerParams(
                dimension_semantics=("parallel", "parallel"),
                vmem_limit_bytes=_vmem_limit_bytes(proj_foot)),
        )(x_mm, wq_mm, wk_mm, wv_mm)

        # ---------------- flash attention + unifyHeads ----------------
        attn_foot = (tq * (10 * hk + 8 * k + 1024) + tkv * (8 * hk)
                     + hk * k * 2 + 4 * k)
        return pl.pallas_call(
            functools.partial(_attention_kernel, k=k, heads=heads,
                              mm_dtype=mm_dtype),
            out_shape=jax.ShapeDtypeStruct((b, t, k), out_dtype),
            grid_spec=pltpu.PrefetchScalarGridSpec(
                num_scalar_prefetch=0,
                grid=(b, n_q, n_kv),
                in_specs=[
                    pl.BlockSpec((1, tq, hk), lambda i, j, l: (i, j, 0)),
                    pl.BlockSpec((1, tkv, hk), lambda i, j, l: (i, l, 0)),
                    pl.BlockSpec((1, tkv, hk), lambda i, j, l: (i, l, 0)),
                    const_spec((hk, k), lambda i, j, l: (0, 0)),
                    const_spec((1, k), lambda i, j, l: (0, 0)),
                ],
                out_specs=pl.BlockSpec((1, tq, k), lambda i, j, l: (i, j, 0)),
                scratch_shapes=[
                    pltpu.VMEM((tq, heads), jnp.float32),   # running max  m
                    pltpu.VMEM((tq, heads), jnp.float32),   # running sum  l
                    pltpu.VMEM((tq, hk), jnp.float32),      # f32 accumulators
                    pltpu.VMEM((tq, hk), mm_dtype),         # bf16 head outputs
                ],
            ),
            compiler_params=pltpu.CompilerParams(
                dimension_semantics=("parallel", "parallel", "arbitrary"),
                vmem_limit_bytes=_vmem_limit_bytes(attn_foot)),
        )(q_all, k_all, v_all, wu_mm, bu2)

    try:
        return run(single_buffer_consts=True)
    except Exception:
        # pipeline_mode=pl.Buffered(1) (single-buffered constant operands) not
        # supported on this JAX/Mosaic version -> default double buffering.
        return run(single_buffer_consts=False)


def self_attention_ref(x, wq_t, wk_t, wv_t, wu_t, bu, *, heads):
    """Pure-JAX f32 reference matching the PyTorch forward exactly."""
    b, t, k = x.shape
    h = heads
    q = (x @ wq_t).reshape(b, t, h, k).transpose(0, 2, 1, 3)    # (b, h, t, k)
    ky = (x @ wk_t).reshape(b, t, h, k).transpose(0, 2, 1, 3)
    v = (x @ wv_t).reshape(b, t, h, k).transpose(0, 2, 1, 3)
    scale = k ** 0.25
    q = q / scale
    ky = ky / scale
    dot = jnp.einsum("bhtk,bhsk->bhts", q, ky)
    dot = jax.nn.softmax(dot, axis=-1)
    out = jnp.einsum("bhts,bhsk->bhtk", dot, v)                 # (b, h, t, k)
    out = out.transpose(0, 2, 1, 3).reshape(b, t, h * k)
    return out @ wu_t + bu


if __name__ == "__main__":
    # Small deterministic config.
    b, t, k, heads = 2, 8, 16, 8
    hk = heads * k

    key = jax.random.PRNGKey(0)
    kx, kq, kk_, kv, ku, kb = jax.random.split(key, 6)

    x = jax.random.normal(kx, (b, t, k), dtype=jnp.float32)

    # nn.Linear(k, k*heads, bias=False).weight has shape (k*heads, k);
    # we store the transpose (k, k*heads) so the kernels compute x @ W.
    wq_t = jax.random.normal(kq, (k, hk), dtype=jnp.float32) * 0.1
    wk_t = jax.random.normal(kk_, (k, hk), dtype=jnp.float32) * 0.1
    wv_t = jax.random.normal(kv, (k, hk), dtype=jnp.float32) * 0.1
    # nn.Linear(heads*k, k).weight has shape (k, heads*k); transpose -> (hk, k).
    wu_t = jax.random.normal(ku, (hk, k), dtype=jnp.float32) * 0.1
    bu = jax.random.normal(kb, (k,), dtype=jnp.float32) * 0.1

    out = self_attention(x, wq_t, wk_t, wv_t, wu_t, bu, heads=heads)
    out = jax.block_until_ready(out)

    ref = self_attention_ref(x, wq_t, wk_t, wv_t, wu_t, bu, heads=heads)
    assert out.shape == (b, t, k)
    # bf16 MXU inputs + approx reciprocal -> loosen tolerance vs f32 reference.
    assert jnp.allclose(out, ref, atol=2e-2, rtol=2e-2), (
        f"max abs err {jnp.max(jnp.abs(out - ref))}")

    print("KERNEL_OK")
</pallas_src>

<mosaic_0001>
module attributes {stable_mosaic.version = 11 : i64} {
  func.func @_qkv_proj_kernel(%arg0: i32, %arg1: i32, %arg2: memref<1x8x16xbf16, #tpu.memory_space<vmem>>, %arg3: memref<16x128xbf16, #tpu.memory_space<vmem>>, %arg4: memref<16x128xbf16, #tpu.memory_space<vmem>>, %arg5: memref<16x128xbf16, #tpu.memory_space<vmem>>, %arg6: memref<1x8x128xbf16, #tpu.memory_space<vmem>>, %arg7: memref<1x8x128xbf16, #tpu.memory_space<vmem>>, %arg8: memref<1x8x128xbf16, #tpu.memory_space<vmem>>) attributes {dimension_semantics = [#tpu.dimension_semantics<parallel>, #tpu.dimension_semantics<parallel>], iteration_bounds = array<i64: 2, 1>, scalar_prefetch = 0 : i64, scratch_operands = 0 : i64, tpu.core_type = #tpu.core_type<tc>, window_params = [{transform_indices = @transform_0, window_bounds = array<i64: 1, 8, 16>}, {pipeline_mode = #tpu.pipeline_mode<synchronous>, transform_indices = @transform_1, window_bounds = array<i64: 16, 128>}, {pipeline_mode = #tpu.pipeline_mode<synchronous>, transform_indices = @transform_2, window_bounds = array<i64: 16, 128>}, {pipeline_mode = #tpu.pipeline_mode<synchronous>, transform_indices = @transform_3, window_bounds = array<i64: 16, 128>}, {transform_indices = @transform_4, window_bounds = array<i64: 1, 8, 128>}, {transform_indices = @transform_5, window_bounds = array<i64: 1, 8, 128>}, {transform_indices = @transform_6, window_bounds = array<i64: 1, 8, 128>}]} {
    %c0 = arith.constant 0 : index
    %c0_0 = arith.constant 0 : index
    %c0_1 = arith.constant 0 : index
    %0 = vector.load %arg2[%c0, %c0_0, %c0_1] : memref<1x8x16xbf16, #tpu.memory_space<vmem>>, vector<1x8x16xbf16>
    %1 = vector.shape_cast %0 : vector<1x8x16xbf16> to vector<8x16xbf16>
    %c0_2 = arith.constant 0 : index
    %c0_3 = arith.constant 0 : index
    %2 = vector.load %arg3[%c0_2, %c0_3] : memref<16x128xbf16, #tpu.memory_space<vmem>>, vector<16x128xbf16>
    %cst = arith.constant dense<0.000000e+00> : vector<8x128xf32>
    %3 = tpu.matmul %1, %2, %cst {dimension_numbers = #tpu.dot_dimension_numbers<[1], [0], [0], [1], [0, 0, 1, 1], [], []>} : vector<8x16xbf16>, vector<16x128xbf16>, vector<8x128xf32> -> vector<8x128xf32>
    %4 = arith.truncf %3 : vector<8x128xf32> to vector<8x128xbf16>
    %c0_4 = arith.constant 0 : index
    %c0_5 = arith.constant 0 : index
    %c0_6 = arith.constant 0 : index
    %5 = vector.load %arg6[%c0_4, %c0_5, %c0_6] : memref<1x8x128xbf16, #tpu.memory_space<vmem>>, vector<1x8x128xbf16>
    %6 = vector.shape_cast %5 : vector<1x8x128xbf16> to vector<8x128xbf16>
    %7 = vector.shape_cast %4 : vector<8x128xbf16> to vector<1x8x128xbf16>
    tpu.vector_store %arg6[%c0_4, %c0_5, %c0_6], %7 {strides = array<i32>} : memref<1x8x128xbf16, #tpu.memory_space<vmem>>, vector<1x8x128xbf16>,
    %c0_7 = arith.constant 0 : index
    %c0_8 = arith.constant 0 : index
    %8 = vector.load %arg4[%c0_7, %c0_8] : memref<16x128xbf16, #tpu.memory_space<vmem>>, vector<16x128xbf16>
    %cst_9 = arith.constant dense<0.000000e+00> : vector<8x128xf32>
    %9 = tpu.matmul %1, %8, %cst_9 {dimension_numbers = #tpu.dot_dimension_numbers<[1], [0], [0], [1], [0, 0, 1, 1], [], []>} : vector<8x16xbf16>, vector<16x128xbf16>, vector<8x128xf32> -> vector<8x128xf32>
    %10 = arith.truncf %9 : vector<8x128xf32> to vector<8x128xbf16>
    %c0_10 = arith.constant 0 : index
    %c0_11 = arith.constant 0 : index
    %c0_12 = arith.constant 0 : index
    %11 = vector.load %arg7[%c0_10, %c0_11, %c0_12] : memref<1x8x128xbf16, #tpu.memory_space<vmem>>, vector<1x8x128xbf16>
    %12 = vector.shape_cast %11 : vector<1x8x128xbf16> to vector<8x128xbf16>
    %13 = vector.shape_cast %10 : vector<8x128xbf16> to vector<1x8x128xbf16>
    tpu.vector_store %arg7[%c0_10, %c0_11, %c0_12], %13 {strides = array<i32>} : memref<1x8x128xbf16, #tpu.memory_space<vmem>>, vector<1x8x128xbf16>,
    %c0_13 = arith.constant 0 : index
    %c0_14 = arith.constant 0 : index
    %14 = vector.load %arg5[%c0_13, %c0_14] : memref<16x128xbf16, #tpu.memory_space<vmem>>, vector<16x128xbf16>
    %cst_15 = arith.constant dense<0.000000e+00> : vector<8x128xf32>
    %15 = tpu.matmul %1, %14, %cst_15 {dimension_numbers = #tpu.dot_dimension_numbers<[1], [0], [0], [1], [0, 0, 1, 1], [], []>} : vector<8x16xbf16>, vector<16x128xbf16>, vector<8x128xf32> -> vector<8x128xf32>
    %16 = arith.truncf %15 : vector<8x128xf32> to vector<8x128xbf16>
    %c0_16 = arith.constant 0 : index
    %c0_17 = arith.constant 0 : index
    %c0_18 = arith.constant 0 : index
    %17 = vector.load %arg8[%c0_16, %c0_17, %c0_18] : memref<1x8x128xbf16, #tpu.memory_space<vmem>>, vector<1x8x128xbf16>
    %18 = vector.shape_cast %17 : vector<1x8x128xbf16> to vector<8x128xbf16>
    %19 = vector.shape_cast %16 : vector<8x128xbf16> to vector<1x8x128xbf16>
    tpu.vector_store %arg8[%c0_16, %c0_17, %c0_18], %19 {strides = array<i32>} : memref<1x8x128xbf16, #tpu.memory_space<vmem>>, vector<1x8x128xbf16>,
    return
  }
  func.func @transform_0(%arg0: i32, %arg1: i32) -> (i32, i32, i32) {
    %c0_i32 = arith.constant 0 : i32
    %c0_i32_0 = arith.constant 0 : i32
    return %arg0, %arg1, %c0_i32 : i32, i32, i32
  }
  func.func @transform_1(%arg0: i32, %arg1: i32) -> (i32, i32) {
    %c0_i32 = arith.constant 0 : i32
    %c0_i32_0 = arith.constant 0 : i32
    %c0_i32_1 = arith.constant 0 : i32
    return %c0_i32, %c0_i32_0 : i32, i32
  }
  func.func @transform_2(%arg0: i32, %arg1: i32) -> (i32, i32) {
    %c0_i32 = arith.constant 0 : i32
    %c0_i32_0 = arith.constant 0 : i32
    %c0_i32_1 = arith.constant 0 : i32
    return %c0_i32, %c0_i32_0 : i32, i32
  }
  func.func @transform_3(%arg0: i32, %arg1: i32) -> (i32, i32) {
    %c0_i32 = arith.constant 0 : i32
    %c0_i32_0 = arith.constant 0 : i32
    %c0_i32_1 = arith.constant 0 : i32
    return %c0_i32, %c0_i32_0 : i32, i32
  }
  func.func @transform_4(%arg0: i32, %arg1: i32) -> (i32, i32, i32) {
    %c0_i32 = arith.constant 0 : i32
    %c0_i32_0 = arith.constant 0 : i32
    return %arg0, %arg1, %c0_i32 : i32, i32, i32
  }
  func.func @transform_5(%arg0: i32, %arg1: i32) -> (i32, i32, i32) {
    %c0_i32 = arith.constant 0 : i32
    %c0_i32_0 = arith.constant 0 : i32
    return %arg0, %arg1, %c0_i32 : i32, i32, i32
  }
  func.func @transform_6(%arg0: i32, %arg1: i32) -> (i32, i32, i32) {
    %c0_i32 = arith.constant 0 : i32
    %c0_i32_0 = arith.constant 0 : i32
    return %arg0, %arg1, %c0_i32 : i32, i32, i32
  }
}

module attributes {stable_mosaic.version = 11 : i64} {
  func.func @_qkv_proj_kernel(%arg0: i32, %arg1: i32, %arg2: memref<1x8x16xbf16, #tpu.memory_space<vmem>>, %arg3: memref<16x128xbf16, #tpu.memory_space<vmem>>, %arg4: memref<16x128xbf16, #tpu.memory_space<vmem>>, %arg5: memref<16x128xbf16, #tpu.memory_space<vmem>>, %arg6: memref<1x8x128xbf16, #tpu.memory_space<vmem>>, %arg7: memref<1x8x128xbf16, #tpu.memory_space<vmem>>, %arg8: memref<1x8x128xbf16, #tpu.memory_space<vmem>>) attributes {dimension_semantics = [#tpu.dimension_semantics<parallel>, #tpu.dimension_semantics<parallel>], iteration_bounds = array<i64: 2, 1>, scalar_prefetch = 0 : i64, scratch_operands = 0 : i64, tpu.core_type = #tpu.core_type<tc>, window_params = [{transform_indices = @transform_0, window_bounds = array<i64: 1, 8, 16>}, {pipeline_mode = #tpu.pipeline_mode<synchronous>, transform_indices = @transform_1, window_bounds = array<i64: 16, 128>}, {pipeline_mode = #tpu.pipeline_mode<synchronous>, transform_indices = @transform_2, window_bounds = array<i64: 16, 128>}, {pipeline_mode = #tpu.pipeline_mode<synchronous>, transform_indices = @transform_3, window_bounds = array<i64: 16, 128>}, {transform_indices = @transform_4, window_bounds = array<i64: 1, 8, 128>}, {transform_indices = @transform_5, window_bounds = array<i64: 1, 8, 128>}, {transform_indices = @transform_6, window_bounds = array<i64: 1, 8, 128>}]} {
    %c0 = arith.constant 0 : index
    %c0_0 = arith.constant 0 : index
    %c0_1 = arith.constant 0 : index
    %0 = vector.load %arg2[%c0, %c0_0, %c0_1] : memref<1x8x16xbf16, #tpu.memory_space<vmem>>, vector<1x8x16xbf16>
    %1 = vector.shape_cast %0 : vector<1x8x16xbf16> to vector<8x16xbf16>
    %c0_2 = arith.constant 0 : index
    %c0_3 = arith.constant 0 : index
    %2 = vector.load %arg3[%c0_2, %c0_3] : memref<16x128xbf16, #tpu.memory_space<vmem>>, vector<16x128xbf16>
    %cst = arith.constant dense<0.000000e+00> : vector<8x128xf32>
    %3 = tpu.matmul %1, %2, %cst {dimension_numbers = #tpu.dot_dimension_numbers<[1], [0], [0], [1], [0, 0, 1, 1], [], []>} : vector<8x16xbf16>, vector<16x128xbf16>, vector<8x128xf32> -> vector<8x128xf32>
    %4 = arith.truncf %3 : vector<8x128xf32> to vector<8x128xbf16>
    %c0_4 = arith.constant 0 : index
    %c0_5 = arith.constant 0 : index
    %c0_6 = arith.constant 0 : index
    %5 = vector.load %arg6[%c0_4, %c0_5, %c0_6] : memref<1x8x128xbf16, #tpu.memory_space<vmem>>, vector<1x8x128xbf16>
    %6 = vector.shape_cast %5 : vector<1x8x128xbf16> to vector<8x128xbf16>
    %7 = vector.shape_cast %4 : vector<8x128xbf16> to vector<1x8x128xbf16>
    tpu.vector_store %arg6[%c0_4, %c0_5, %c0_6], %7 {strides = array<i32>} : memref<1x8x128xbf16, #tpu.memory_space<vmem>>, vector<1x8x128xbf16>,
    %c0_7 = arith.constant 0 : index
    %c0_8 = arith.constant 0 : index
    %8 = vector.load %arg4[%c0_7, %c0_8] : memref<16x128xbf16, #tpu.memory_space<vmem>>, vector<16x128xbf16>
    %cst_9 = arith.constant dense<0.000000e+00> : vector<8x128xf32>
    %9 = tpu.matmul %1, %8, %cst_9 {dimension_numbers = #tpu.dot_dimension_numbers<[1], [0], [0], [1], [0, 0, 1, 1], [], []>} : vector<8x16xbf16>, vector<16x128xbf16>, vector<8x128xf32> -> vector<8x128xf32>
    %10 = arith.truncf %9 : vector<8x128xf32> to vector<8x128xbf16>
    %c0_10 = arith.constant 0 : index
    %c0_11 = arith.constant 0 : index
    %c0_12 = arith.constant 0 : index
    %11 = vector.load %arg7[%c0_10, %c0_11, %c0_12] : memref<1x8x128xbf16, #tpu.memory_space<vmem>>, vector<1x8x128xbf16>
    %12 = vector.shape_cast %11 : vector<1x8x128xbf16> to vector<8x128xbf16>
    %13 = vector.shape_cast %10 : vector<8x128xbf16> to vector<1x8x128xbf16>
    tpu.vector_store %arg7[%c0_10, %c0_11, %c0_12], %13 {strides = array<i32>} : memref<1x8x128xbf16, #tpu.memory_space<vmem>>, vector<1x8x128xbf16>,
    %c0_13 = arith.constant 0 : index
    %c0_14 = arith.constant 0 : index
    %14 = vector.load %arg5[%c0_13, %c0_14] : memref<16x128xbf16, #tpu.memory_space<vmem>>, vector<16x128xbf16>
    %cst_15 = arith.constant dense<0.000000e+00> : vector<8x128xf32>
    %15 = tpu.matmul %1, %14, %cst_15 {dimension_numbers = #tpu.dot_dimension_numbers<[1], [0], [0], [1], [0, 0, 1, 1], [], []>} : vector<8x16xbf16>, vector<16x128xbf16>, vector<8x128xf32> -> vector<8x128xf32>
    %16 = arith.truncf %15 : vector<8x128xf32> to vector<8x128xbf16>
    %c0_16 = arith.constant 0 : index
    %c0_17 = arith.constant 0 : index
    %c0_18 = arith.constant 0 : index
    %17 = vector.load %arg8[%c0_16, %c0_17, %c0_18] : memref<1x8x128xbf16, #tpu.memory_space<vmem>>, vector<1x8x128xbf16>
    %18 = vector.shape_cast %17 : vector<1x8x128xbf16> to vector<8x128xbf16>
    %19 = vector.shape_cast %16 : vector<8x128xbf16> to vector<1x8x128xbf16>
    tpu.vector_store %arg8[%c0_16, %c0_17, %c0_18], %19 {strides = array<i32>} : memref<1x8x128xbf16, #tpu.memory_space<vmem>>, vector<1x8x128xbf16>,
    return
  }
  func.func @transform_0(%arg0: i32, %arg1: i32) -> (i32, i32, i32) {
    %c0_i32 = arith.constant 0 : i32
    %c0_i32_0 = arith.constant 0 : i32
    return %arg0, %arg1, %c0_i32 : i32, i32, i32
  }
  func.func @transform_1(%arg0: i32, %arg1: i32) -> (i32, i32) {
    %c0_i32 = arith.constant 0 : i32
    %c0_i32_0 = arith.constant 0 : i32
    %c0_i32_1 = arith.constant 0 : i32
    return %c0_i32, %c0_i32_0 : i32, i32
  }
  func.func @transform_2(%arg0: i32, %arg1: i32) -> (i32, i32) {
    %c0_i32 = arith.constant 0 : i32
    %c0_i32_0 = arith.constant 0 : i32
    %c0_i32_1 = arith.constant 0 : i32
    return %c0_i32, %c0_i32_0 : i32, i32
  }
  func.func @transform_3(%arg0: i32, %arg1: i32) -> (i32, i32) {
    %c0_i32 = arith.constant 0 : i32
    %c0_i32_0 = arith.constant 0 : i32
    %c0_i32_1 = arith.constant 0 : i32
    return %c0_i32, %c0_i32_0 : i32, i32
  }
  func.func @transform_4(%arg0: i32, %arg1: i32) -> (i32, i32, i32) {
    %c0_i32 = arith.constant 0 : i32
    %c0_i32_0 = arith.constant 0 : i32
    return %arg0, %arg1, %c0_i32 : i32, i32, i32
  }
  func.func @transform_5(%arg0: i32, %arg1: i32) -> (i32, i32, i32) {
    %c0_i32 = arith.constant 0 : i32
    %c0_i32_0 = arith.constant 0 : i32
    return %arg0, %arg1, %c0_i32 : i32, i32, i32
  }
  func.func @transform_6(%arg0: i32, %arg1: i32) -> (i32, i32, i32) {
    %c0_i32 = arith.constant 0 : i32
    %c0_i32_0 = arith.constant 0 : i32
    return %arg0, %arg1, %c0_i32 : i32, i32, i32
  }
}

</mosaic_0001>

<bundles_post_ra>
// kernel: tpu_custom_call.1
= control target key start
LH: loop header
LB: loop body
LE: loop exit
PB: predicated region body
PF: predicated region fallthrough
CT: control target
= control target key end

     0   :  { %s1476_s0 = inlined_call_operand.hbm [shape: bf16[2,8,16], index: 0, kind: input, shape index: {}]   ;;  %s1477_s1 = inlined_call_operand.hbm [shape: bf16[16,128], index: 1, kind: input, shape index: {}]   ;;  %s1478_s2 = inlined_call_operand.hbm [shape: bf16[16,128], index: 2, kind: input, shape index: {}]   ;;  %s1479_s3 = inlined_call_operand.vmem [shape: bf16[16,128], index: 3, kind: input, shape index: {}]   ;;  %s1480_s4 = inlined_call_operand.hbm [shape: bf16[2,8,128], index: 4, kind: output, shape index: {0}]   ;;  %s1481_s5 = inlined_call_operand.hbm [shape: bf16[2,8,128], index: 5, kind: output, shape index: {1}]   ;;  %s1482_s6 = inlined_call_operand.hbm [shape: bf16[2,8,128], index: 6, kind: output, shape index: {2}]  }
   0x1   :  { %1488 = sst [smem:[#allocation16_spill]] %s1476_s0 }
   0x2   :  { %12 = vsyncpa [#allocation3], 0 }
   0x3   :  { %14 = vsyncpa [#allocation3 + $0x1], 0 }
   0x4   :  { %15 = vsyncpa [#allocation6], 0 }
   0x5   :  { %16 = vsyncpa [#allocation4], 0 }
   0x6   :  { %18 = vsyncpa [#allocation4 + $0x1], 0 }
   0x7   :  { %19 = vsyncpa [#allocation10], 0 }
   0x8   :  { %21 = vsyncpa [#allocation10 + $0x1], 0  ;;  %s1138_s21 = smov 0   ;;  %s1140_s22 = smov 0  }
   0x9   :  { %s1142_s23 = smov 0   ;;  %s1144_s24 = smov 0  }
   0xa   :  { %s1146_s25 = smov 0   ;;  %s1148_s26 = smov 0  }
   0xb LB: > { %s1169_s27 = sadd.s32 4294967295, %s1091_s26   ;;  %s1484_s28 = sadd.s32 4294967294, %s1091_s26   ;;  %s1091_s26 = sphi %s1148_s26, %s27_s26   ;;  %s1087_s25 = sphi %s1146_s25, %s1510_s25   ;;  %s1083_s24 = sphi %s1144_s24, %s1509_s24   ;;  %s1079_s23 = sphi %s1142_s23, %s1508_s23   ;;  %s1075_s22 = sphi %s1140_s22, %s1507_s22   ;;  %s1071_s21 = sphi %s1138_s21, %s1506_s21  }
   0xc   : > { %p61_p0 = scmp.ne.s32.totalorder %s1075_s22, %s1071_s21  ;;  %p1483_p1 = scmp.eq.s32.totalorder %s1169_s27, 0 }
   0xd   : > { %p156_p3 = scmp.eq.s32.totalorder %s1484_s28, 1  ;;  %p708_p5 = scmp.ge.s32.totalorder %s1091_s26, 1 }
   0xe   : > { %p1180_p4 = por %p1483_p1, %p61_p0  ;;  %p219_p7 = scmp.lt.s32.totalorder %s1091_s26, 3 }
   0xf   : > { %p1185_p6 = por %p156_p3, %p61_p0  ;;  %s1093_s8 = smov [#allocation5]  }
  0x10   : > { %s1489_s29 = scalar_select %p1180_p4, 1, 0 }
  0x11   : > { %s1490_s30 = scalar_select %p1185_p6, 1, 0 }
  0x12   : > { %p1190_p8 = pnand %p708_p5, %p219_p7  ;;  %s231_s9 = sshll.u32 %s1093_s8, 4  ;;  %s1194_s9 = int_to_ptr.vmem [resolvable:$true] %s231_s9 }
  0x13   : > { %s1094_s11 = smov [#allocation7]   ;;  %s859_s15 = scalar_lea.hbm %s1477_s1, 128 }
  0x14   : > { %p775_p9 = pneg %p1190_p8  ;;  %s244_s12 = sshll.u32 %s1094_s11, 4  ;;  %s1205_s12 = int_to_ptr.vmem [resolvable:$true] %s244_s12 }
  0x15   : > { %p860_p12 = scmp.ne.s32.totalorder %s1477_s1, %s859_s15  ;;  %p866_p5 = scmp.lt.u32.totalorder %s859_s15, %s1477_s1 }
  0x16   : > { %p1201_p11 = pnand %p775_p9, %p1483_p1 }
  0x18   : > { %p861_p13 = pneg %p1201_p11 }
  0x1a   : > { %p862_p0 = pnand %p861_p13, %p860_p12 }
  0x1c   : > { %p863_p3 = pneg %p862_p0 }
  0x1e   : > { %p868_p7 = pnand %p866_p5, %p863_p3 }
  0x20   : > { %871 = shalt.err (!%p868_p7)
}
  0x21   : > { %s872_s20 = scalar_lea.vmem %s1194_s9, 128  ;;  %p880_p2 = scmp.lt.s32.totalorder %s1194_s9, %s1194_s9 }
  0x22   : > { %p873_p9 = scmp.ne.s32.totalorder %s1194_s9, %s872_s20  ;;  %p881_p12 = scmp.lt.s32.totalorder %s872_s20, %s872_s20 }
  0x24   : > { %p875_p10 = pnand %p873_p9, %p861_p13  ;;  %p882_p0 = por %p881_p12, %p880_p2 }
  0x26   : > { %p876_p1 = pneg %p875_p10 }
  0x28   : > { %p883_p6 = pnand %p882_p0, %p876_p1 }
  0x2a   : > { %886 = shalt.err (!%p883_p6)
}
  0x2b   : > { %s1095_s8 = smov 64   ;;  %s1096_s11 = smov 4  }
  0x2c   : > { %778 = dma.hbm_to_vmem [thread:$0]  (!%p1201_p11), %s1477_s1, 128, %s1194_s9, [#allocation6], %s1095_s8, %s1095_s8, %s1096_s11  }
  0x2d   : > { %s887_s17 = scalar_lea.hbm %s1478_s2, 128 }
  0x2e   : > { %p888_p2 = scmp.ne.s32.totalorder %s1478_s2, %s887_s17  ;;  %p894_p10 = scmp.lt.u32.totalorder %s887_s17, %s1478_s2 }
  0x30   : > { %p890_p1 = pnand %p888_p2, %p861_p13 }
  0x32   : > { %p891_p6 = pneg %p890_p1 }
  0x34   : > { %p896_p3 = pnand %p894_p10, %p891_p6 }
  0x36   : > { %899 = shalt.err (!%p896_p3)
}
  0x37   : > { %s900_s9 = scalar_lea.vmem %s1205_s12, 128  ;;  %p908_p12 = scmp.lt.s32.totalorder %s1205_s12, %s1205_s12 }
  0x38   : > { %p901_p5 = scmp.ne.s32.totalorder %s1205_s12, %s900_s9  ;;  %p909_p0 = scmp.lt.s32.totalorder %s900_s9, %s900_s9 }
  0x3a   : > { %p903_p7 = pnand %p901_p5, %p861_p13  ;;  %p910_p2 = por %p909_p0, %p908_p12 }
  0x3c   : > { %p904_p9 = pneg %p903_p7 }
  0x3e   : > { %p911_p1 = pnand %p910_p2, %p904_p9 }
  0x40   : > { %914 = shalt.err (!%p911_p1)
}
  0x41   : > { %781 = dma.hbm_to_vmem [thread:$0]  (!%p1201_p11), %s1478_s2, 128, %s1205_s12, [#allocation6], %s1095_s8, %s1095_s8, %s1096_s11  }
  0x42   : > { %s39_s14 = sadd.s32 1, %s1087_s25  ;;  %s48_s15 = sadd.s32 1, %s1079_s23 }
  0x43   : > { %p41_p13 = scmp.ge.s32.totalorder %s39_s14, 2  ;;  %p55_p6 = scmp.ne.s32.totalorder %s1079_s23, %s1075_s22 }
  0x44   : > { %p56_p10 = scmp.eq.s32.totalorder %s1091_s26, 0  ;;  %p798_p3 = scmp.lt.s32.totalorder %s1091_s26, 2 }
  0x45   : > { %s1512_s14 = smov (%p41_p13, %s39_s14), 0  ;;  %p1493_p7 = scmp.eq.s32.totalorder %s1169_s27, 1 }
  0x46   : > { %p57_p5 = por %p56_p10, %p55_p6  ;;  %s43_s16 = ssub.s32 %s1087_s25, %s1512_s14 }
  0x47   : > { %p1269_p9 = por %p1493_p7, %p55_p6  ;;  %s261_s17 = sand.u32 1, %s1079_s23  }
  0x48   : > { %p46_p12 = scmp.eq.s32.totalorder %s43_s16, 0  ;;  %s712_s12 = sshll.u32 %s261_s17, 2 }
  0x49   : > { %s1494_s10 = scalar_select %p1269_p9, 1, 0 }
  0x4a   : > { %s713_s8 = sshll.u32 %s1087_s25, 6  ;;  %s1495_s0 = sld [smem:[#allocation16_spill]] }
  0x4b   : > { %s1278_s11 = scalar_select %p46_p12, %s1079_s23, %s48_s15  }
  0x4c   : > { %s265_s9 = scalar_lea.vmem [#allocation2], %s712_s12  ;;  %p1287_p11 = pnand %p798_p3, %p57_p5 }
  0x4d   : > { %s273_s28 = sshll.u32 %s265_s9, 4  ;;  %s262_s15 = scalar_lea.sflag [#allocation3], %s261_s17  ;;  %s1291_s28 = int_to_ptr.vmem [resolvable:$true] %s273_s28 }
  0x4e   : > { %p917_p2 = pneg %p1287_p11 }
  0x50   : > { %s1283_s20 = scalar_lea.hbm %s1495_s0, %s713_s8  ;;  %s920_s18 = scalar_lea.hbm %s1495_s0, 128 }
  0x51   : > { %s915_s16 = scalar_lea.hbm %s1283_s20, 64  ;;  %p921_p6 = scmp.lt.u32.totalorder %s1283_s20, %s1495_s0 }
  0x52   : > { %p916_p0 = scmp.ne.s32.totalorder %s1283_s20, %s915_s16  ;;  %p922_p10 = scmp.lt.u32.totalorder %s920_s18, %s915_s16 }
  0x53   : > { %p924_p5 = scmp.lt.u32.totalorder %s915_s16, %s1283_s20 }
  0x54   : > { %p918_p1 = pnand %p917_p2, %p916_p0  ;;  %p923_p3 = por %p922_p10, %p921_p6 }
  0x56   : > { %p919_p13 = pneg %p918_p1  ;;  %p925_p7 = por %p924_p5, %p923_p3 }
  0x58   : > { %p926_p12 = pnand %p925_p7, %p919_p13 }
  0x5a   : > { %929 = shalt.err (!%p926_p12)
}
  0x5b   : > { %s930_s17 = scalar_lea.vmem %s1291_s28, 64  ;;  %s1097_s12 = smov [#allocation2]  }
  0x5c   : > { %p931_p0 = scmp.ne.s32.totalorder %s1291_s28, %s930_s17  ;;  %s935_s8 = sshll.u32 %s1097_s12, 4  ;;  %s936_s8 = int_to_ptr.vmem [resolvable:$false] %s935_s8 }
  0x5d   : > { %s937_s19 = scalar_lea.vmem %s936_s8, 128  ;;  %p938_p4 = scmp.lt.s32.totalorder %s1291_s28, %s936_s8 }
  0x5e   : > { %p933_p1 = pnand %p931_p0, %p917_p2  ;;  %p939_p6 = scmp.lt.s32.totalorder %s937_s19, %s930_s17 }
  0x60   : > { %p934_p9 = pneg %p933_p1  ;;  %p940_p10 = por %p939_p6, %p938_p4 }
  0x62   : > { %p941_p3 = pnand %p940_p10, %p934_p9 }
  0x64   : > { %944 = shalt.err (!%p941_p3)
}
  0x65   : > { %785 = dma.hbm_to_vmem [thread:$0]  (!%p1287_p11), %s1283_s20, 64, %s1291_s28, %s262_s15  }
  0x66   : > { %282 = sbr.rel (%p1190_p8) target bundleno = 402 (0x192), region = 36  ;;  %s1321_s16 = sand.u32 (!%p1190_p8), 1, %s1075_s22  }
  0x67   : > { %s1324_s18 = sshll.u32 (!%p1190_p8), %s1321_s16, 2  ;;  %s285_s9 = scalar_lea.sflag (!%p1190_p8), [#allocation3], %s1321_s16 }
  0x68   : > { %s288_s17 = scalar_lea.vmem (!%p1190_p8), [#allocation2], %s1324_s18  ;;  %p1497_p4 = scmp.ne.s32.totalorder (!%p1190_p8), %s1489_s29, 0 }
  0x6d   : > { %1054 = dma.done.wait (%p1497_p4), %s285_s9, 64  }
  0x6e   : > { %1056 = vsyncadd (%p1497_p4), %s285_s9, 4294967232  ;;  %p1498_p9 = scmp.eq.s32.totalorder %s1169_s27, 0 }
  0x70   : > { %1058 = dma.done.wait (%p1498_p9), [#allocation6], 256   ;;  %p1499_p8 = pmov %p1498_p9 }
  0x71   : > { %v1098_v0 = vmov 0.0   ;;  %vm1099_vm0 = vmmov 0   ;;  %v856_v1 = vld [vmem:[#allocation5] sm:$0xff]   ;;  %v336_v2 = vld [vmem:[%s288_s17] sm:$0xf]  ;;  %vm345_vm1 = vcmask 130048  }
  0x72   : > { %1060 = vsyncadd (%p1499_p8), [#allocation6], 4294967040  ;;  %741 = vmatprep.subr.bf16.mxu0 %v1098_v0  ;;  %743 = vmatprep.mubr.msk.bf16.mxu0 %vm1099_vm0, %v1098_v0  ;;  %v857_v3 = vld [vmem:[%s1479_s3] sm:$0xff]   ;;  %v858_v4 = vld [vmem:[#allocation7] sm:$0xff]   ;;  %s1340_s20 = sshll.u32 %s1083_s24, 6  ;;  %s320_s28 = scalar_lea.vmem [#allocation8], %s1324_s18 }
  0x73   : > { %747 = vmatprep.subr.bf16.mxu1 %v1098_v0  ;;  %749 = vmatprep.mubr.msk.bf16.mxu1 %vm1099_vm0, %v1098_v0  ;;  %s516_s13 = sshll.u32 %s320_s28, 4  ;;  %s1487_s12 = scalar_lea.vmem [#allocation9], %s1324_s18  ;;  %s1353_s13 = int_to_ptr.vmem [resolvable:$true] %s516_s13 }
  0x74   : > { %742 = vmatpush3.bf16.msra.mxu0 %v856_v1  ;;  %748 = vmatpush3.bf16.msra.mxu1 %v858_v4  ;;  %s530_s8 = sshll.u32 %s1487_s12, 4  ;;  %s1351_s17 = scalar_lea.hbm %s1480_s4, %s1340_s20  ;;  %s1361_s8 = int_to_ptr.vmem [resolvable:$true] %s530_s8 }
  0x75   : > { %753 = vmatprep.subr.bf16.mxu0 %v1098_v0  ;;  %s1359_s7 = scalar_lea.hbm %s1481_s5, %s1340_s20  ;;  %s492_s19 = scalar_lea.sflag [#allocation4], %s1321_s16 }
  0x76   : > { %s945_s9 = scalar_lea.vmem %s1353_s13, 64  ;;  %p1500_p2 = scmp.ne.s32.totalorder %s1494_s10, 0 }
  0x77   : > { %744 = vmatmul.mubr.msk.bf16.vlgmr.msra.gmra.mrb[0].mxu0 %vm345_vm1, %v336_v2  ;;  %750 = vmatmul.mubr.msk.bf16.vlgmr.msra.gmra.mrb[0].mxu1 %vm345_vm1, %v336_v2  ;;  %p946_p11 = scmp.ne.s32.totalorder %s1353_s13, %s945_s9  ;;  %s1100_s15 = smov [#allocation8]  }
  0x78   : > { %754 = vmatpush3.bf16.msra.mxu0 %v857_v3  ;;  %755 = vmatprep.mubr.msk.bf16.mxu0 %vm1099_vm0, %v1098_v0 }
  0x79   : > { %p947_p13 = pnand %p946_p11, %p1500_p2 }
  0x7b   : > { %p948_p5 = pneg %p947_p13 }
  0x7f   : > { %756 = vmatmul.mubr.msk.bf16.vlgmr.msra.gmra.mrb[4].mxu0 %vm345_vm1, %v336_v2 }
 0x14a   : > { %v383_v5 = vpop.f32.mrb[0].mxu0  ;;  %v433_v10 = vpop.f32.mrb[0].mxu1 }
 0x14b   : > { %v389_v6 = vpack.c.bf16 %v383_v5, %v383_v5  ;;  %v745_v7 = vpop.f32.mrb[1].mxu0  ;;  %v439_v11 = vpack.c.bf16 %v433_v10, %v433_v10  ;;  %v751_v12 = vpop.f32.mrb[1].mxu1 }
 0x14c   : > { %v386_v8 = vpop.f32.mrb[2].mxu0 }
 0x14d   : > { %390 = vst [vmem:[%s320_s28] sm:$0xf] %v389_v6  ;;  %v746_v9 = vpop.f32.mrb[3].mxu0  ;;  %s949_s28 = sshll.u32 %s1100_s15, 4  ;;  %s950_s28 = int_to_ptr.vmem [resolvable:$false] %s949_s28 }
 0x14e   : > { %s951_s12 = scalar_lea.vmem %s950_s28, 128  ;;  %p952_p7 = scmp.lt.s32.totalorder %s1353_s13, %s950_s28 }
 0x14f   : > { %p953_p12 = scmp.lt.s32.totalorder %s951_s12, %s945_s9 }
 0x151   : > { %p954_p0 = por %p953_p12, %p952_p7 }
 0x153   : > { %p955_p1 = pnand %p954_p0, %p948_p5 }
 0x155   : > { %958 = shalt.err (!%p955_p1)
}
 0x156   : > { %s959_s16 = scalar_lea.hbm %s1351_s17, 64  ;;  %s963_s15 = scalar_lea.hbm %s1480_s4, 128 }
 0x157   : > { %p960_p6 = scmp.ne.s32.totalorder %s1351_s17, %s959_s16  ;;  %p964_p4 = scmp.lt.u32.totalorder %s1351_s17, %s1480_s4 }
 0x158   : > { %p965_p9 = scmp.lt.u32.totalorder %s963_s15, %s959_s16  ;;  %p967_p11 = scmp.lt.u32.totalorder %s959_s16, %s1351_s17 }
 0x159   : > { %p961_p10 = pnand %p960_p6, %p1500_p2 }
 0x15a   : > { %p966_p8 = por %p965_p9, %p964_p4 }
 0x15b   : > { %p962_p3 = pneg %p961_p10 }
 0x15c   : > { %p968_p13 = por %p967_p11, %p966_p8 }
 0x15e   : > { %p969_p5 = pnand %p968_p13, %p962_p3 }
 0x160   : > { %972 = shalt.err (!%p969_p5)
}
 0x161   : > { %769 = dma.vmem_to_hbm [thread:$0]  (%p1500_p2), %s1353_s13, 64, %s1351_s17, %s492_s19   ;;  %v436_v13 = vpop.f32.mrb[2].mxu1 }
 0x162   : > { %s1501_s0 = scalar_lea.vmem [#allocation9], %s1324_s18  ;;  %v752_v14 = vpop.f32.mrb[3].mxu1  ;;  %s334_s12 = scalar_lea.vmem [#allocation11], %s1324_s18 }
 0x163   : > { %440 = vst [vmem:[%s1501_s0] sm:$0xf] %v439_v11  ;;  %s1390_s9 = sshll.u32 %s334_s12, 4  ;;  %s1502_s16 = sand.u32 1, %s1169_s27   ;;  %s1425_s9 = int_to_ptr.vmem [resolvable:$true] %s1390_s9 }
 0x164   : > { %s1394_s24 = scalar_lea.sflag [#allocation10], %s1502_s16  ;;  %s973_s29 = scalar_lea.vmem %s1361_s8, 64 }
 0x165   : > { %p974_p7 = scmp.ne.s32.totalorder %s1361_s8, %s973_s29  ;;  %s1101_s15 = smov [#allocation9]  }
 0x166   : > { %s977_s28 = sshll.u32 %s1101_s15, 4  ;;  %s978_s28 = int_to_ptr.vmem [resolvable:$false] %s977_s28 }
 0x167   : > { %p975_p12 = pnand %p974_p7, %p1500_p2  ;;  %s979_s13 = scalar_lea.vmem %s978_s28, 128 }
 0x168   : > { %p980_p1 = scmp.lt.s32.totalorder %s1361_s8, %s978_s28  ;;  %p981_p6 = scmp.lt.s32.totalorder %s979_s13, %s973_s29 }
 0x169   : > { %p976_p0 = pneg %p975_p12 }
 0x16a   : > { %p982_p10 = por %p981_p6, %p980_p1 }
 0x16c   : > { %p983_p3 = pnand %p982_p10, %p976_p0 }
 0x16e   : > { %986 = shalt.err (!%p983_p3)
}
 0x16f   : > { %s987_s27 = scalar_lea.hbm %s1359_s7, 64  ;;  %s991_s0 = scalar_lea.hbm %s1481_s5, 128 }
 0x170   : > { %p988_p4 = scmp.ne.s32.totalorder %s1359_s7, %s987_s27  ;;  %p992_p11 = scmp.lt.u32.totalorder %s1359_s7, %s1481_s5 }
 0x171   : > { %p993_p13 = scmp.lt.u32.totalorder %s991_s0, %s987_s27  ;;  %p995_p7 = scmp.lt.u32.totalorder %s987_s27, %s1359_s7 }
 0x172   : > { %p989_p9 = pnand %p988_p4, %p1500_p2 }
 0x173   : > { %p994_p5 = por %p993_p13, %p992_p11 }
 0x174   : > { %p990_p8 = pneg %p989_p9 }
 0x175   : > { %p996_p12 = por %p995_p7, %p994_p5 }
 0x177   : > { %p997_p0 = pnand %p996_p12, %p990_p8 }
 0x179   : > { %1000 = shalt.err (!%p997_p0)
}
 0x17a   : > { %770 = dma.vmem_to_hbm [thread:$0]  (%p1500_p2), %s1361_s8, 64, %s1359_s7, %s1394_s24   ;;  %v483_v15 = vpop.f32.mrb[4].mxu0 }
 0x17b   : > { %v489_v16 = vpack.c.bf16 %v483_v15, %v483_v15  ;;  %v757_v17 = vpop.f32.mrb[5].mxu0  ;;  %s1422_s13 = scalar_lea.hbm %s1482_s6, %s1340_s20  ;;  %s1001_s27 = scalar_lea.vmem %s1425_s9, 64 }
 0x17c   : > { %v486_v18 = vpop.f32.mrb[6].mxu0  ;;  %p1002_p1 = scmp.ne.s32.totalorder %s1425_s9, %s1001_s27  ;;  %s1102_s8 = smov [#allocation11]  }
 0x17d   : > { %490 = vst [vmem:[%s334_s12] sm:$0xf] %v489_v16  ;;  %v758_v19 = vpop.f32.mrb[7].mxu0  ;;  %s1005_s7 = sshll.u32 %s1102_s8, 4  ;;  %s1006_s7 = int_to_ptr.vmem [resolvable:$false] %s1005_s7 }
 0x17e   : > { %p1003_p6 = pnand %p1002_p1, %p1500_p2  ;;  %s1007_s17 = scalar_lea.vmem %s1006_s7, 128 }
 0x17f   : > { %p1008_p3 = scmp.lt.s32.totalorder %s1425_s9, %s1006_s7  ;;  %p1009_p4 = scmp.lt.s32.totalorder %s1007_s17, %s1001_s27 }
 0x180   : > { %p1004_p10 = pneg %p1003_p6 }
 0x181   : > { %p1010_p9 = por %p1009_p4, %p1008_p3 }
 0x183   : > { %p1011_p8 = pnand %p1010_p9, %p1004_p10 }
 0x185   : > { %1014 = shalt.err (!%p1011_p8)
}
 0x186   : > { %s1015_s18 = scalar_lea.hbm %s1422_s13, 64  ;;  %s1019_s19 = scalar_lea.hbm %s1482_s6, 128 }
 0x187   : > { %p1016_p11 = scmp.ne.s32.totalorder %s1422_s13, %s1015_s18  ;;  %p1020_p7 = scmp.lt.u32.totalorder %s1422_s13, %s1482_s6 }
 0x188   : > { %p1021_p12 = scmp.lt.u32.totalorder %s1019_s19, %s1015_s18  ;;  %p1023_p1 = scmp.lt.u32.totalorder %s1015_s18, %s1422_s13 }
 0x189   : > { %p1017_p13 = pnand %p1016_p11, %p1500_p2 }
 0x18a   : > { %p1022_p0 = por %p1021_p12, %p1020_p7 }
 0x18b   : > { %p1018_p5 = pneg %p1017_p13 }
 0x18c   : > { %p1024_p6 = por %p1023_p1, %p1022_p0 }
 0x18e   : > { %p1025_p10 = pnand %p1024_p6, %p1018_p5 }
 0x190   : > { %1028 = shalt.err (!%p1025_p10)
}
 0x191   : > { %771 = dma.vmem_to_hbm [thread:$0]  (%p1500_p2), %s1425_s9, 64, %s1422_s13, %s1394_s24  }
 0x192 PF: > { %s556_s15 = sand.u32 1, %s1071_s21   ;;  %p1503_p3 = scmp.ne.s32.totalorder %s1490_s30, 0 }
 0x193   : > { %p1504_p4 = scmp.ge.s32.totalorder %s1091_s26, 2  ;;  %s557_s29 = scalar_lea.sflag [#allocation4], %s556_s15 }
 0x195   : > { %p787_p9 = pnand %p1504_p4, %p1503_p3 }
 0x197   : > { %1062 = dma.done.wait (!%p787_p9), %s557_s29, 64  }
 0x198   : > { %1064 = vsyncadd (!%p787_p9), %s557_s29, 4294967232  ;;  %s1505_s28 = sadd.s32 4294967294, %s1091_s26  }
 0x199   : > { %s565_s27 = sand.u32 1, %s1505_s28  }
 0x19a   : > { %s566_s8 = scalar_lea.sflag [#allocation10], %s565_s27 }
 0x19b   : > { %1066 = dma.done.wait (!%p787_p9), %s566_s8, 128  }
 0x19c   : > { %1068 = vsyncadd (!%p787_p9), %s566_s8, 4294967168  ;;  %s27_s26 = sadd.s32 1, %s1091_s26   ;;  %s1506_s21 = smov %s1075_s22 }
 0x19d   : > { %p24_p2 = scmp.ge.s32.totalorder %s27_s26, 4   ;;  %s1507_s22 = smov %s1079_s23 }
 0x19e   : > { %s1508_s23 = smov %s1278_s11  ;;  %s1509_s24 = smov %s1087_s25 }
 0x19f   : > { %s1510_s25 = smov %s1512_s14  ;;  %26 = sbr.rel (!%p24_p2) target bundleno = 11 (0xb), region = 121 }
 0x1a6   :  { %580 = vsyncpa [#allocation3], 1 }
 0x1a7   :  { %582 = vsyncpa [#allocation3 + $0x1], 1 }
 0x1a8   :  { %583 = vsyncpa [#allocation6], 1 }
 0x1a9   :  { %584 = vsyncpa [#allocation4], 1 }
 0x1aa   :  { %586 = vsyncpa [#allocation4 + $0x1], 1 }
 0x1ab   :  { %587 = vsyncpa [#allocation10], 1 }
 0x1ac   :  { %589 = vsyncpa [#allocation10 + $0x1], 1 }

// kernel: tpu_custom_call.1
= control target key start
LH: loop header
LB: loop body
LE: loop exit
PB: predicated region body
PF: predicated region fallthrough
CT: control target
= control target key end

     0   :  { %s1476_s0 = inlined_call_operand.hbm [shape: bf16[2,8,16], index: 0, kind: input, shape index: {}]   ;;  %s1477_s1 = inlined_call_operand.hbm [shape: bf16[16,128], index: 1, kind: input, shape index: {}]   ;;  %s1478_s2 = inlined_call_operand.hbm [shape: bf16[16,128], index: 2, kind: input, shape index: {}]   ;;  %s1479_s3 = inlined_call_operand.vmem [shape: bf16[16,128], index: 3, kind: input, shape index: {}]   ;;  %s1480_s4 = inlined_call_operand.hbm [shape: bf16[2,8,128], index: 4, kind: output, shape index: {0}]   ;;  %s1481_s5 = inlined_call_operand.hbm [shape: bf16[2,8,128], index: 5, kind: output, shape index: {1}]   ;;  %s1482_s6 = inlined_call_operand.hbm [shape: bf16[2,8,128], index: 6, kind: output, shape index: {2}]  }
   0x1   :  { %1488 = sst [smem:[#allocation16_spill]] %s1476_s0 }
   0x2   :  { %12 = vsyncpa [#allocation3], 0 }
   0x3   :  { %14 = vsyncpa [#allocation3 + $0x1], 0 }
   0x4   :  { %15 = vsyncpa [#allocation6], 0 }
   0x5   :  { %16 = vsyncpa [#allocation4], 0 }
   0x6   :  { %18 = vsyncpa [#allocation4 + $0x1], 0 }
   0x7   :  { %19 = vsyncpa [#allocation10], 0 }
   0x8   :  { %21 = vsyncpa [#allocation10 + $0x1], 0  ;;  %s1138_s21 = smov 0   ;;  %s1140_s22 = smov 0  }
   0x9   :  { %s1142_s23 = smov 0   ;;  %s1144_s24 = smov 0  }
   0xa   :  { %s1146_s25 = smov 0   ;;  %s1148_s26 = smov 0  }
   0xb LB: > { %s1169_s27 = sadd.s32 4294967295, %s1091_s26   ;;  %s1484_s28 = sadd.s32 4294967294, %s1091_s26   ;;  %s1091_s26 = sphi %s1148_s26, %s27_s26   ;;  %s1087_s25 = sphi %s1146_s25, %s1510_s25   ;;  %s1083_s24 = sphi %s1144_s24, %s1509_s24   ;;  %s1079_s23 = sphi %s1142_s23, %s1508_s23   ;;  %s1075_s22 = sphi %s1140_s22, %s1507_s22   ;;  %s1071_s21 = sphi %s1138_s21, %s1506_s21  }
   0xc   : > { %p61_p0 = scmp.ne.s32.totalorder %s1075_s22, %s1071_s21  ;;  %p1483_p1 = scmp.eq.s32.totalorder %s1169_s27, 0 }
   0xd   : > { %p156_p3 = scmp.eq.s32.totalorder %s1484_s28, 1  ;;  %p708_p5 = scmp.ge.s32.totalorder %s1091_s26, 1 }
   0xe   : > { %p1180_p4 = por %p1483_p1, %p61_p0  ;;  %p219_p7 = scmp.lt.s32.totalorder %s1091_s26, 3 }
   0xf   : > { %p1185_p6 = por %p156_p3, %p61_p0  ;;  %s1093_s8 = smov [#allocation5]  }
  0x10   : > { %s1489_s29 = scalar_select %p1180_p4, 1, 0 }
  0x11   : > { %s1490_s30 = scalar_select %p1185_p6, 1, 0 }
  0x12   : > { %p1190_p8 = pnand %p708_p5, %p219_p7  ;;  %s231_s9 = sshll.u32 %s1093_s8, 4  ;;  %s1194_s9 = int_to_ptr.vmem [resolvable:$true] %s231_s9 }
  0x13   : > { %s1094_s11 = smov [#allocation7]   ;;  %s859_s15 = scalar_lea.hbm %s1477_s1, 128 }
  0x14   : > { %p775_p9 = pneg %p1190_p8  ;;  %s244_s12 = sshll.u32 %s1094_s11, 4  ;;  %s1205_s12 = int_to_ptr.vmem [resolvable:$true] %s244_s12 }
  0x15   : > { %p860_p12 = scmp.ne.s32.totalorder %s1477_s1, %s859_s15  ;;  %p866_p5 = scmp.lt.u32.totalorder %s859_s15, %s1477_s1 }
  0x16   : > { %p1201_p11 = pnand %p775_p9, %p1483_p1 }
  0x18   : > { %p861_p13 = pneg %p1201_p11 }
  0x1a   : > { %p862_p0 = pnand %p861_p13, %p860_p12 }
  0x1c   : > { %p863_p3 = pneg %p862_p0 }
  0x1e   : > { %p868_p7 = pnand %p866_p5, %p863_p3 }
  0x20   : > { %871 = shalt.err (!%p868_p7)
}
  0x21   : > { %s872_s20 = scalar_lea.vmem %s1194_s9, 128  ;;  %p880_p2 = scmp.lt.s32.totalorder %s1194_s9, %s1194_s9 }
  0x22   : > { %p873_p9 = scmp.ne.s32.totalorder %s1194_s9, %s872_s20  ;;  %p881_p12 = scmp.lt.s32.totalorder %s872_s20, %s872_s20 }
  0x24   : > { %p875_p10 = pnand %p873_p9, %p861_p13  ;;  %p882_p0 = por %p881_p12, %p880_p2 }
  0x26   : > { %p876_p1 = pneg %p875_p10 }
  0x28   : > { %p883_p6 = pnand %p882_p0, %p876_p1 }
  0x2a   : > { %886 = shalt.err (!%p883_p6)
}
  0x2b   : > { %s1095_s8 = smov 64   ;;  %s1096_s11 = smov 4  }
  0x2c   : > { %778 = dma.hbm_to_vmem [thread:$0]  (!%p1201_p11), %s1477_s1, 128, %s1194_s9, [#allocation6], %s1095_s8, %s1095_s8, %s1096_s11  }
  0x2d   : > { %s887_s17 = scalar_lea.hbm %s1478_s2, 128 }
  0x2e   : > { %p888_p2 = scmp.ne.s32.totalorder %s1478_s2, %s887_s17  ;;  %p894_p10 = scmp.lt.u32.totalorder %s887_s17, %s1478_s2 }
  0x30   : > { %p890_p1 = pnand %p888_p2, %p861_p13 }
  0x32   : > { %p891_p6 = pneg %p890_p1 }
  0x34   : > { %p896_p3 = pnand %p894_p10, %p891_p6 }
  0x36   : > { %899 = shalt.err (!%p896_p3)
}
  0x37   : > { %s900_s9 = scalar_lea.vmem %s1205_s12, 128  ;;  %p908_p12 = scmp.lt.s32.totalorder %s1205_s12, %s1205_s12 }
  0x38   : > { %p901_p5 = scmp.ne.s32.totalorder %s1205_s12, %s900_s9  ;;  %p909_p0 = scmp.lt.s32.totalorder %s900_s9, %s900_s9 }
  0x3a   : > { %p903_p7 = pnand %p901_p5, %p861_p13  ;;  %p910_p2 = por %p909_p0, %p908_p12 }
  0x3c   : > { %p904_p9 = pneg %p903_p7 }
  0x3e   : > { %p911_p1 = pnand %p910_p2, %p904_p9 }
  0x40   : > { %914 = shalt.err (!%p911_p1)
}
  0x41   : > { %781 = dma.hbm_to_vmem [thread:$0]  (!%p1201_p11), %s1478_s2, 128, %s1205_s12, [#allocation6], %s1095_s8, %s1095_s8, %s1096_s11  }
  0x42   : > { %s39_s14 = sadd.s32 1, %s1087_s25  ;;  %s48_s15 = sadd.s32 1, %s1079_s23 }
  0x43   : > { %p41_p13 = scmp.ge.s32.totalorder %s39_s14, 2  ;;  %p55_p6 = scmp.ne.s32.totalorder %s1079_s23, %s1075_s22 }
  0x44   : > { %p56_p10 = scmp.eq.s32.totalorder %s1091_s26, 0  ;;  %p798_p3 = scmp.lt.s32.totalorder %s1091_s26, 2 }
  0x45   : > { %s1512_s14 = smov (%p41_p13, %s39_s14), 0  ;;  %p1493_p7 = scmp.eq.s32.totalorder %s1169_s27, 1 }
  0x46   : > { %p57_p5 = por %p56_p10, %p55_p6  ;;  %s43_s16 = ssub.s32 %s1087_s25, %s1512_s14 }
  0x47   : > { %p1269_p9 = por %p1493_p7, %p55_p6  ;;  %s261_s17 = sand.u32 1, %s1079_s23  }
  0x48   : > { %p46_p12 = scmp.eq.s32.totalorder %s43_s16, 0  ;;  %s712_s12 = sshll.u32 %s261_s17, 2 }
  0x49   : > { %s1494_s10 = scalar_select %p1269_p9, 1, 0 }
  0x4a   : > { %s713_s8 = sshll.u32 %s1087_s25, 6  ;;  %s1495_s0 = sld [smem:[#allocation16_spill]] }
  0x4b   : > { %s1278_s11 = scalar_select %p46_p12, %s1079_s23, %s48_s15  }
  0x4c   : > { %s265_s9 = scalar_lea.vmem [#allocation2], %s712_s12  ;;  %p1287_p11 = pnand %p798_p3, %p57_p5 }
  0x4d   : > { %s273_s28 = sshll.u32 %s265_s9, 4  ;;  %s262_s15 = scalar_lea.sflag [#allocation3], %s261_s17  ;;  %s1291_s28 = int_to_ptr.vmem [resolvable:$true] %s273_s28 }
  0x4e   : > { %p917_p2 = pneg %p1287_p11 }
  0x50   : > { %s1283_s20 = scalar_lea.hbm %s1495_s0, %s713_s8  ;;  %s920_s18 = scalar_lea.hbm %s1495_s0, 128 }
  0x51   : > { %s915_s16 = scalar_lea.hbm %s1283_s20, 64  ;;  %p921_p6 = scmp.lt.u32.totalorder %s1283_s20, %s1495_s0 }
  0x52   : > { %p916_p0 = scmp.ne.s32.totalorder %s1283_s20, %s915_s16  ;;  %p922_p10 = scmp.lt.u32.totalorder %s920_s18, %s915_s16 }
  0x53   : > { %p924_p5 = scmp.lt.u32.totalorder %s915_s16, %s1283_s20 }
  0x54   : > { %p918_p1 = pnand %p917_p2, %p916_p0  ;;  %p923_p3 = por %p922_p10, %p921_p6 }
  0x56   : > { %p919_p13 = pneg %p918_p1  ;;  %p925_p7 = por %p924_p5, %p923_p3 }
  0x58   : > { %p926_p12 = pnand %p925_p7, %p919_p13 }
  0x5a   : > { %929 = shalt.err (!%p926_p12)
}
  0x5b   : > { %s930_s17 = scalar_lea.vmem %s1291_s28, 64  ;;  %s1097_s12 = smov [#allocation2]  }
  0x5c   : > { %p931_p0 = scmp.ne.s32.totalorder %s1291_s28, %s930_s17  ;;  %s935_s8 = sshll.u32 %s1097_s12, 4  ;;  %s936_s8 = int_to_ptr.vmem [resolvable:$false] %s935_s8 }
  0x5d   : > { %s937_s19 = scalar_lea.vmem %s936_s8, 128  ;;  %p938_p4 = scmp.lt.s32.totalorder %s1291_s28, %s936_s8 }
  0x5e   : > { %p933_p1 = pnand %p931_p0, %p917_p2  ;;  %p939_p6 = scmp.lt.s32.totalorder %s937_s19, %s930_s17 }
  0x60   : > { %p934_p9 = pneg %p933_p1  ;;  %p940_p10 = por %p939_p6, %p938_p4 }
  0x62   : > { %p941_p3 = pnand %p940_p10, %p934_p9 }
  0x64   : > { %944 = shalt.err (!%p941_p3)
}
  0x65   : > { %785 = dma.hbm_to_vmem [thread:$0]  (!%p1287_p11), %s1283_s20, 64, %s1291_s28, %s262_s15  }
  0x66   : > { %282 = sbr.rel (%p1190_p8) target bundleno = 402 (0x192), region = 36  ;;  %s1321_s16 = sand.u32 (!%p1190_p8), 1, %s1075_s22  }
  0x67   : > { %s1324_s18 = sshll.u32 (!%p1190_p8), %s1321_s16, 2  ;;  %s285_s9 = scalar_lea.sflag (!%p1190_p8), [#allocation3], %s1321_s16 }
  0x68   : > { %s288_s17 = scalar_lea.vmem (!%p1190_p8), [#allocation2], %s1324_s18  ;;  %p1497_p4 = scmp.ne.s32.totalorder (!%p1190_p8), %s1489_s29, 0 }
  0x6d   : > { %1054 = dma.done.wait (%p1497_p4), %s285_s9, 64  }
  0x6e   : > { %1056 = vsyncadd (%p1497_p4), %s285_s9, 4294967232  ;;  %p1498_p9 = scmp.eq.s32.totalorder %s1169_s27, 0 }
  0x70   : > { %1058 = dma.done.wait (%p1498_p9), [#allocation6], 256   ;;  %p1499_p8 = pmov %p1498_p9 }
  0x71   : > { %v1098_v0 = vmov 0.0   ;;  %vm1099_vm0 = vmmov 0   ;;  %v856_v1 = vld [vmem:[#allocation5] sm:$0xff]   ;;  %v336_v2 = vld [vmem:[%s288_s17] sm:$0xf]  ;;  %vm345_vm1 = vcmask 130048  }
  0x72   : > { %1060 = vsyncadd (%p1499_p8), [#allocation6], 4294967040  ;;  %741 = vmatprep.subr.bf16.mxu0 %v1098_v0  ;;  %743 = vmatprep.mubr.msk.bf16.mxu0 %vm1099_vm0, %v1098_v0  ;;  %v857_v3 = vld [vmem:[%s1479_s3] sm:$0xff]   ;;  %v858_v4 = vld [vmem:[#allocation7] sm:$0xff]   ;;  %s1340_s20 = sshll.u32 %s1083_s24, 6  ;;  %s320_s28 = scalar_lea.vmem [#allocation8], %s1324_s18 }
  0x73   : > { %747 = vmatprep.subr.bf16.mxu1 %v1098_v0  ;;  %749 = vmatprep.mubr.msk.bf16.mxu1 %vm1099_vm0, %v1098_v0  ;;  %s516_s13 = sshll.u32 %s320_s28, 4  ;;  %s1487_s12 = scalar_lea.vmem [#allocation9], %s1324_s18  ;;  %s1353_s13 = int_to_ptr.vmem [resolvable:$true] %s516_s13 }
  0x74   : > { %742 = vmatpush3.bf16.msra.mxu0 %v856_v1  ;;  %748 = vmatpush3.bf16.msra.mxu1 %v858_v4  ;;  %s530_s8 = sshll.u32 %s1487_s12, 4  ;;  %s1351_s17 = scalar_lea.hbm %s1480_s4, %s1340_s20  ;;  %s1361_s8 = int_to_ptr.vmem [resolvable:$true] %s530_s8 }
  0x75   : > { %753 = vmatprep.subr.bf16.mxu0 %v1098_v0  ;;  %s1359_s7 = scalar_lea.hbm %s1481_s5, %s1340_s20  ;;  %s492_s19 = scalar_lea.sflag [#allocation4], %s1321_s16 }
  0x76   : > { %s945_s9 = scalar_lea.vmem %s1353_s13, 64  ;;  %p1500_p2 = scmp.ne.s32.totalorder %s1494_s10, 0 }
  0x77   : > { %744 = vmatmul.mubr.msk.bf16.vlgmr.msra.gmra.mrb[0].mxu0 %vm345_vm1, %v336_v2  ;;  %750 = vmatmul.mubr.msk.bf16.vlgmr.msra.gmra.mrb[0].mxu1 %vm345_vm1, %v336_v2  ;;  %p946_p11 = scmp.ne.s32.totalorder %s1353_s13, %s945_s9  ;;  %s1100_s15 = smov [#allocation8]  }
  0x78   : > { %754 = vmatpush3.bf16.msra.mxu0 %v857_v3  ;;  %755 = vmatprep.mubr.msk.bf16.mxu0 %vm1099_vm0, %v1098_v0 }
  0x79   : > { %p947_p13 = pnand %p946_p11, %p1500_p2 }
  0x7b   : > { %p948_p5 = pneg %p947_p13 }
  0x7f   : > { %756 = vmatmul.mubr.msk.bf16.vlgmr.msra.gmra.mrb[4].mxu0 %vm345_vm1, %v336_v2 }
 0x14a   : > { %v383_v5 = vpop.f32.mrb[0].mxu0  ;;  %v433_v10 = vpop.f32.mrb[0].mxu1 }
 0x14b   : > { %v389_v6 = vpack.c.bf16 %v383_v5, %v383_v5  ;;  %v745_v7 = vpop.f32.mrb[1].mxu0  ;;  %v439_v11 = vpack.c.bf16 %v433_v10, %v433_v10  ;;  %v751_v12 = vpop.f32.mrb[1].mxu1 }
 0x14c   : > { %v386_v8 = vpop.f32.mrb[2].mxu0 }
 0x14d   : > { %390 = vst [vmem:[%s320_s28] sm:$0xf] %v389_v6  ;;  %v746_v9 = vpop.f32.mrb[3].mxu0  ;;  %s949_s28 = sshll.u32 %s1100_s15, 4  ;;  %s950_s28 = int_to_ptr.vmem [resolvable:$false] %s949_s28 }
 0x14e   : > { %s951_s12 = scalar_lea.vmem %s950_s28, 128  ;;  %p952_p7 = scmp.lt.s32.totalorder %s1353_s13, %s950_s28 }
 0x14f   : > { %p953_p12 = scmp.lt.s32.totalorder %s951_s12, %s945_s9 }
 0x151   : > { %p954_p0 = por %p953_p12, %p952_p7 }
 0x153   : > { %p955_p1 = pnand %p954_p0, %p948_p5 }
 0x155   : > { %958 = shalt.err (!%p955_p1)
}
 0x156   : > { %s959_s16 = scalar_lea.hbm %s1351_s17, 64  ;;  %s963_s15 = scalar_lea.hbm %s1480_s4, 128 }
 0x157   : > { %p960_p6 = scmp.ne.s32.totalorder %s1351_s17, %s959_s16  ;;  %p964_p4 = scmp.lt.u32.totalorder %s1351_s17, %s1480_s4 }
 0x158   : > { %p965_p9 = scmp.lt.u32.totalorder %s963_s15, %s959_s16  ;;  %p967_p11 = scmp.lt.u32.totalorder %s959_s16, %s1351_s17 }
 0x159   : > { %p961_p10 = pnand %p960_p6, %p1500_p2 }
 0x15a   : > { %p966_p8 = por %p965_p9, %p964_p4 }
 0x15b   : > { %p962_p3 = pneg %p961_p10 }
 0x15c   : > { %p968_p13 = por %p967_p11, %p966_p8 }
 0x15e   : > { %p969_p5 = pnand %p968_p13, %p962_p3 }
 0x160   : > { %972 = shalt.err (!%p969_p5)
}
 0x161   : > { %769 = dma.vmem_to_hbm [thread:$0]  (%p1500_p2), %s1353_s13, 64, %s1351_s17, %s492_s19   ;;  %v436_v13 = vpop.f32.mrb[2].mxu1 }
 0x162   : > { %s1501_s0 = scalar_lea.vmem [#allocation9], %s1324_s18  ;;  %v752_v14 = vpop.f32.mrb[3].mxu1  ;;  %s334_s12 = scalar_lea.vmem [#allocation11], %s1324_s18 }
 0x163   : > { %440 = vst [vmem:[%s1501_s0] sm:$0xf] %v439_v11  ;;  %s1390_s9 = sshll.u32 %s334_s12, 4  ;;  %s1502_s16 = sand.u32 1, %s1169_s27   ;;  %s1425_s9 = int_to_ptr.vmem [resolvable:$true] %s1390_s9 }
 0x164   : > { %s1394_s24 = scalar_lea.sflag [#allocation10], %s1502_s16  ;;  %s973_s29 = scalar_lea.vmem %s1361_s8, 64 }
 0x165   : > { %p974_p7 = scmp.ne.s32.totalorder %s1361_s8, %s973_s29  ;;  %s1101_s15 = smov [#allocation9]  }
 0x166   : > { %s977_s28 = sshll.u32 %s1101_s15, 4  ;;  %s978_s28 = int_to_ptr.vmem [resolvable:$false] %s977_s28 }
 0x167   : > { %p975_p12 = pnand %p974_p7, %p1500_p2  ;;  %s979_s13 = scalar_lea.vmem %s978_s28, 128 }
 0x168   : > { %p980_p1 = scmp.lt.s32.totalorder %s1361_s8, %s978_s28  ;;  %p981_p6 = scmp.lt.s32.totalorder %s979_s13, %s973_s29 }
 0x169   : > { %p976_p0 = pneg %p975_p12 }
 0x16a   : > { %p982_p10 = por %p981_p6, %p980_p1 }
 0x16c   : > { %p983_p3 = pnand %p982_p10, %p976_p0 }
 0x16e   : > { %986 = shalt.err (!%p983_p3)
}
 0x16f   : > { %s987_s27 = scalar_lea.hbm %s1359_s7, 64  ;;  %s991_s0 = scalar_lea.hbm %s1481_s5, 128 }
 0x170   : > { %p988_p4 = scmp.ne.s32.totalorder %s1359_s7, %s987_s27  ;;  %p992_p11 = scmp.lt.u32.totalorder %s1359_s7, %s1481_s5 }
 0x171   : > { %p993_p13 = scmp.lt.u32.totalorder %s991_s0, %s987_s27  ;;  %p995_p7 = scmp.lt.u32.totalorder %s987_s27, %s1359_s7 }
 0x172   : > { %p989_p9 = pnand %p988_p4, %p1500_p2 }
 0x173   : > { %p994_p5 = por %p993_p13, %p992_p11 }
 0x174   : > { %p990_p8 = pneg %p989_p9 }
 0x175   : > { %p996_p12 = por %p995_p7, %p994_p5 }
 0x177   : > { %p997_p0 = pnand %p996_p12, %p990_p8 }
 0x179   : > { %1000 = shalt.err (!%p997_p0)
}
 0x17a   : > { %770 = dma.vmem_to_hbm [thread:$0]  (%p1500_p2), %s1361_s8, 64, %s1359_s7, %s1394_s24   ;;  %v483_v15 = vpop.f32.mrb[4].mxu0 }
 0x17b   : > { %v489_v16 = vpack.c.bf16 %v483_v15, %v483_v15  ;;  %v757_v17 = vpop.f32.mrb[5].mxu0  ;;  %s1422_s13 = scalar_lea.hbm %s1482_s6, %s1340_s20  ;;  %s1001_s27 = scalar_lea.vmem %s1425_s9, 64 }
 0x17c   : > { %v486_v18 = vpop.f32.mrb[6].mxu0  ;;  %p1002_p1 = scmp.ne.s32.totalorder %s1425_s9, %s1001_s27  ;;  %s1102_s8 = smov [#allocation11]  }
 0x17d   : > { %490 = vst [vmem:[%s334_s12] sm:$0xf] %v489_v16  ;;  %v758_v19 = vpop.f32.mrb[7].mxu0  ;;  %s1005_s7 = sshll.u32 %s1102_s8, 4  ;;  %s1006_s7 = int_to_ptr.vmem [resolvable:$false] %s1005_s7 }
 0x17e   : > { %p1003_p6 = pnand %p1002_p1, %p1500_p2  ;;  %s1007_s17 = scalar_lea.vmem %s1006_s7, 128 }
 0x17f   : > { %p1008_p3 = scmp.lt.s32.totalorder %s1425_s9, %s1006_s7  ;;  %p1009_p4 = scmp.lt.s32.totalorder %s1007_s17, %s1001_s27 }
 0x180   : > { %p1004_p10 = pneg %p1003_p6 }
 0x181   : > { %p1010_p9 = por %p1009_p4, %p1008_p3 }
 0x183   : > { %p1011_p8 = pnand %p1010_p9, %p1004_p10 }
 0x185   : > { %1014 = shalt.err (!%p1011_p8)
}
 0x186   : > { %s1015_s18 = scalar_lea.hbm %s1422_s13, 64  ;;  %s1019_s19 = scalar_lea.hbm %s1482_s6, 128 }
 0x187   : > { %p1016_p11 = scmp.ne.s32.totalorder %s1422_s13, %s1015_s18  ;;  %p1020_p7 = scmp.lt.u32.totalorder %s1422_s13, %s1482_s6 }
 0x188   : > { %p1021_p12 = scmp.lt.u32.totalorder %s1019_s19, %s1015_s18  ;;  %p1023_p1 = scmp.lt.u32.totalorder %s1015_s18, %s1422_s13 }
 0x189   : > { %p1017_p13 = pnand %p1016_p11, %p1500_p2 }
 0x18a   : > { %p1022_p0 = por %p1021_p12, %p1020_p7 }
 0x18b   : > { %p1018_p5 = pneg %p1017_p13 }
 0x18c   : > { %p1024_p6 = por %p1023_p1, %p1022_p0 }
 0x18e   : > { %p1025_p10 = pnand %p1024_p6, %p1018_p5 }
 0x190   : > { %1028 = shalt.err (!%p1025_p10)
}
 0x191   : > { %771 = dma.vmem_to_hbm [thread:$0]  (%p1500_p2), %s1425_s9, 64, %s1422_s13, %s1394_s24  }
 0x192 PF: > { %s556_s15 = sand.u32 1, %s1071_s21   ;;  %p1503_p3 = scmp.ne.s32.totalorder %s1490_s30, 0 }
 0x193   : > { %p1504_p4 = scmp.ge.s32.totalorder %s1091_s26, 2  ;;  %s557_s29 = scalar_lea.sflag [#allocation4], %s556_s15 }
 0x195   : > { %p787_p9 = pnand %p1504_p4, %p1503_p3 }
 0x197   : > { %1062 = dma.done.wait (!%p787_p9), %s557_s29, 64  }
 0x198   : > { %1064 = vsyncadd (!%p787_p9), %s557_s29, 4294967232  ;;  %s1505_s28 = sadd.s32 4294967294, %s1091_s26  }
 0x199   : > { %s565_s27 = sand.u32 1, %s1505_s28  }
 0x19a   : > { %s566_s8 = scalar_lea.sflag [#allocation10], %s565_s27 }
 0x19b   : > { %1066 = dma.done.wait (!%p787_p9), %s566_s8, 128  }
 0x19c   : > { %1068 = vsyncadd (!%p787_p9), %s566_s8, 4294967168  ;;  %s27_s26 = sadd.s32 1, %s1091_s26   ;;  %s1506_s21 = smov %s1075_s22 }
 0x19d   : > { %p24_p2 = scmp.ge.s32.totalorder %s27_s26, 4   ;;  %s1507_s22 = smov %s1079_s23 }
 0x19e   : > { %s1508_s23 = smov %s1278_s11  ;;  %s1509_s24 = smov %s1087_s25 }
 0x19f   : > { %s1510_s25 = smov %s1512_s14  ;;  %26 = sbr.rel (!%p24_p2) target bundleno = 11 (0xb), region = 121 }
 0x1a6   :  { %580 = vsyncpa [#allocation3], 1 }
 0x1a7   :  { %582 = vsyncpa [#allocation3 + $0x1], 1 }
 0x1a8   :  { %583 = vsyncpa [#allocation6], 1 }
 0x1a9   :  { %584 = vsyncpa [#allocation4], 1 }
 0x1aa   :  { %586 = vsyncpa [#allocation4 + $0x1], 1 }
 0x1ab   :  { %587 = vsyncpa [#allocation10], 1 }
 0x1ac   :  { %589 = vsyncpa [#allocation10 + $0x1], 1 }

</bundles_post_ra>
